<compile_context>
chip_gen: v7x
topology: tpu7x:2x2x1
jax: 0.10.0
libtpu: 0.0.40
codegen_flags: <defaults>
</compile_context>

<pallas_src>
import math

import jax
import jax.numpy as jnp
import numpy as np
from jax.experimental import pallas as pl
from jax.experimental.pallas import tpu as pltpu


def _stream_embed_kernel(x_ref, e_ref, o_ref):
    """x_ref/o_ref: (tb, tile_r, tile_c) block.  e_ref: full stream-embed table,
    (S, 1, C) for channel_last or (S, R, 1) for channel_first, VMEM-resident."""
    s = pl.program_id(2)                       # stream index = innermost grid axis
    e = e_ref[s]                               # (1, tile_c) row or (tile_r, 1) col
    o_ref[...] = x_ref[...].astype(o_ref.dtype) + e


def _pick_sublane_tile(r, row_bytes, fine_itemsize, target_bytes):
    """Tile along the second-minor axis: multiple of the sublane packing or full."""
    sub = max(8, 32 // max(1, fine_itemsize))   # 8 f32, 16 bf16, 32 int8
    if r * row_bytes <= target_bytes or r <= sub:
        return int(r)
    tr = (target_bytes // row_bytes) // sub * sub
    return int(min(max(tr, sub), r))


def _pick_lane_tile(c, col_bytes, target_bytes):
    """Tile along the minor (lane) axis: multiple of 128 or the full extent."""
    if c * col_bytes <= target_bytes or c < 128:
        return int(c)
    tc = (target_bytes // col_bytes) // 128 * 128
    return int(min(max(tc, 128), c))


def stream_embed_pallas(residuals, stream_embed, *, channel_first=False,
                        expand_to_streams=False,
                        target_tile_bytes=2 * 1024 * 1024):
    """Matches StreamEmbed.forward().  residuals: (b*s, ...) -- or (b, ...) when
    expand_to_streams -- and stream_embed: (num_streams, dim)."""
    num_streams, dim = stream_embed.shape
    x = residuals
    out_dtype = jnp.promote_types(x.dtype, stream_embed.dtype)
    x_is = np.dtype(x.dtype).itemsize
    o_is = np.dtype(out_dtype).itemsize

    lead = x.shape[0]
    if expand_to_streams:
        b = lead
    else:
        assert lead % num_streams == 0, "leading axis must be batch * num_streams"
        b = lead // num_streams

    if channel_first:
        assert x.shape[1] == dim
        spatial = x.shape[2:]
        R, C = dim, math.prod(spatial)          # d on sublanes, spatial on lanes
        e3 = stream_embed.reshape(num_streams, dim, 1).astype(out_dtype)
        # TODO(synk): spatial extent far from a multiple of 128 lowers to masked
        # partial stores; fold/pad at the caller if that path is hot.
    else:
        assert x.shape[-1] == dim
        mid = x.shape[1:-1]
        m = math.prod(mid)
        R, C = m, dim                           # rows on sublanes, d on lanes
        e2 = stream_embed
        if dim % 128 != 0 and dim < 128 and 128 % dim == 0 and (m * dim) % 128 == 0:
            # Lane-density guard: fold middle rows into the 128-lane axis so the
            # output stores stay unmasked (dim is a divisor of 128).
            fold = 128 // dim
            R, C = (m * dim) // 128, 128
            e2 = jnp.tile(stream_embed, (1, fold))
        # TODO(synk): dim > 128 and not a multiple of 128 still lowers to masked
        # partial stores; pad dim at the caller if that path is hot.
        e3 = e2.reshape(num_streams, 1, C).astype(out_dtype)

    # All reshapes below are contiguous (free); nothing is materialized.
    xg = x.reshape((b, R, C) if expand_to_streams else (b, num_streams, R, C))

    # ---- tile sizes (memory-bound: biggest lane-dense blocks near the target) --
    big_is, fine_is = max(x_is, o_is), min(x_is, o_is)
    if channel_first:
        tile_r = R                                        # full channel dim (sublanes)
        tile_c = _pick_lane_tile(C, R * big_is, target_tile_bytes)
        n_tiles = pl.cdiv(C, tile_c)
    else:
        tile_c = C                                        # full channel dim (lanes)
        tile_r = _pick_sublane_tile(R, C * big_is, fine_is, target_tile_bytes)
        n_tiles = pl.cdiv(R, tile_r)
    blk_bytes = tile_r * tile_c * big_is
    tb = int(max(1, min(b, target_tile_bytes // max(1, blk_bytes))))
    nb = pl.cdiv(b, tb)

    grid = (nb, n_tiles, num_streams)                     # stream axis innermost

    # ---- block specs ----------------------------------------------------------
    if channel_first:   # tiled axis = lanes (flattened spatial)
        o_map = lambda i, j, s: (i, s, 0, j)
        x_map = (lambda i, j, s: (i, 0, j)) if expand_to_streams \
            else (lambda i, j, s: (i, s, 0, j))
    else:               # tiled axis = sublanes (flattened middle rows)
        o_map = lambda i, j, s: (i, s, j, 0)
        x_map = (lambda i, j, s: (i, j, 0)) if expand_to_streams \
            else (lambda i, j, s: (i, s, j, 0))
    x_block = (tb, tile_r, tile_c) if expand_to_streams else (tb, None, tile_r, tile_c)
    o_block = (tb, None, tile_r, tile_c)
    # Whole stream-embed table with a constant index_map -> DMA'd once, resident.
    e_spec = pl.BlockSpec(tuple(e3.shape), lambda i, j, s: (0, 0, 0))

    # VMEM budget: double-buffered x/out tiles + resident table (+ slack).
    needed = 2 * tb * tile_r * tile_c * (x_is + o_is) + 2 * int(e3.size) * o_is + (2 << 20)
    vmem_limit = int(max(needed, 32 << 20))

    out4 = pl.pallas_call(
        _stream_embed_kernel,
        out_shape=jax.ShapeDtypeStruct((b, num_streams, R, C), out_dtype),
        grid_spec=pltpu.PrefetchScalarGridSpec(
            num_scalar_prefetch=0,
            grid=grid,
            in_specs=[pl.BlockSpec(x_block, x_map), e_spec],
            out_specs=pl.BlockSpec(o_block, o_map),
        ),
        compiler_params=pltpu.CompilerParams(
            # expand: the stream axis must run sequentially per core so the x
            # block (whose index ignores it) stays resident; the big axes stay
            # "parallel" so v7x megacore shards them across both TensorCores.
            dimension_semantics=("parallel", "parallel",
                                 "arbitrary" if expand_to_streams else "parallel"),
            vmem_limit_bytes=vmem_limit,
        ),
    )(xg, e3)
    # TODO(synk): optionally sweep pl.Buffered(3) on the x/out specs if a trace
    # shows exposed DMA between steps (mainly v7x).

    n_out = b * num_streams
    if channel_first:
        return out4.reshape((n_out, dim) + spatial)
    return out4.reshape((n_out,) + mid + (dim,))


def stream_embed_ref(residuals, stream_embed, *, channel_first=False,
                     expand_to_streams=False):
    """Pure-JAX reference with PyTorch StreamEmbed semantics."""
    num_streams, dim = stream_embed.shape
    x = residuals
    if expand_to_streams:
        x = jnp.repeat(x, num_streams, axis=0)          # 'b ... -> (b s) ...'
    out_dtype = jnp.promote_types(x.dtype, stream_embed.dtype)
    lead = x.shape[0]
    b = lead // num_streams
    if channel_first:
        spatial = x.shape[2:]
        xr = x.reshape((b, num_streams, dim) + spatial).astype(out_dtype)
        emb = stream_embed.reshape(
            (1, num_streams, dim) + (1,) * len(spatial)).astype(out_dtype)
        return (xr + emb).reshape((lead, dim) + spatial)
    mid = x.shape[1:-1]
    xr = x.reshape((b, num_streams) + mid + (dim,)).astype(out_dtype)
    emb = stream_embed.reshape(
        (1, num_streams) + (1,) * len(mid) + (dim,)).astype(out_dtype)
    return (xr + emb).reshape((lead,) + mid + (dim,))


if __name__ == "__main__":
    key = jax.random.PRNGKey(0)
    k1, k2, k3, k4, k5 = jax.random.split(key, 5)

    num_streams, batch, seq, dim = 4, 2, 8, 128
    # Module __init__ zero-inits the embedding; use non-zero values so the add
    # is actually exercised.
    emb = 0.1 * jax.random.normal(k2, (num_streams, dim), dtype=jnp.float32)

    def check(out, ref):
        np.testing.assert_allclose(np.asarray(out), np.asarray(ref),
                                   atol=1e-6, rtol=1e-6)

    # 1) channel_last, residuals already carry the stream axis: (b*s, seq, dim).
    x = jax.random.normal(k1, (batch * num_streams, seq, dim), dtype=jnp.float32)
    out = jax.block_until_ready(stream_embed_pallas(x, emb))
    check(out, stream_embed_ref(x, emb))

    # 2) expand_to_streams: (b, seq, dim) -> (b*s, seq, dim) purely via index_map;
    #    the x block is read from HBM once and reused across all streams.
    x_small = jax.random.normal(k3, (batch, seq, dim), dtype=jnp.float32)
    out = jax.block_until_ready(
        stream_embed_pallas(x_small, emb, expand_to_streams=True))
    check(out, stream_embed_ref(x_small, emb, expand_to_streams=True))

    # 3) channel_first: (b*s, d, h, w) tiled in its native layout (no transposes).
    d_cf, spatial = 32, (4, 32)                          # lanes = 4*32 = 128
    emb_cf = 0.1 * jax.random.normal(k4, (num_streams, d_cf), dtype=jnp.float32)
    x_cf = jax.random.normal(k1, (batch * num_streams, d_cf) + spatial,
                             dtype=jnp.float32)
    out = jax.block_until_ready(
        stream_embed_pallas(x_cf, emb_cf, channel_first=True))
    check(out, stream_embed_ref(x_cf, emb_cf, channel_first=True))

    # 4) channel_first + expand_to_streams.
    x_cf_small = jax.random.normal(k3, (batch, d_cf) + spatial, dtype=jnp.float32)
    out = jax.block_until_ready(stream_embed_pallas(
        x_cf_small, emb_cf, channel_first=True, expand_to_streams=True))
    check(out, stream_embed_ref(x_cf_small, emb_cf, channel_first=True,
                                expand_to_streams=True))

    # 5) narrow channel_last dim (64): middle rows fold into the 128-lane axis.
    emb_n = 0.1 * jax.random.normal(k5, (num_streams, 64), dtype=jnp.float32)
    x_n = jax.random.normal(k1, (batch * num_streams, seq, 64), dtype=jnp.float32)
    out = jax.block_until_ready(stream_embed_pallas(x_n, emb_n))
    check(out, stream_embed_ref(x_n, emb_n))

    # 6) mixed dtypes: bf16 residuals + f32 embedding -> f32 (PyTorch promotion).
    x_bf = x.astype(jnp.bfloat16)
    out = jax.block_until_ready(stream_embed_pallas(x_bf, emb))
    assert out.dtype == jnp.float32
    check(out, stream_embed_ref(x_bf, emb))

    print("KERNEL_OK")
</pallas_src>

<mosaic_0001>
module attributes {stable_mosaic.version = 11 : i64} {
  func.func @_stream_embed_kernel(%arg0: i32, %arg1: i32, %arg2: i32, %arg3: memref<2x1x8x128xf32, #tpu.memory_space<vmem>>, %arg4: memref<4x1x128xf32, #tpu.memory_space<vmem>>, %arg5: memref<2x1x8x128xf32, #tpu.memory_space<vmem>>) attributes {dimension_semantics = [#tpu.dimension_semantics<parallel>, #tpu.dimension_semantics<parallel>, #tpu.dimension_semantics<parallel>], iteration_bounds = array<i64: 1, 1, 4>, scalar_prefetch = 0 : i64, scratch_operands = 0 : i64, tpu.core_type = #tpu.core_type<tc>, window_params = [{transform_indices = @transform_0, window_bounds = array<i64: 2, 1, 8, 128>}, {pipeline_mode = #tpu.pipeline_mode<synchronous>, transform_indices = @transform_1, window_bounds = array<i64: 4, 1, 128>}, {transform_indices = @transform_2, window_bounds = array<i64: 2, 1, 8, 128>}]} {
    %0 = arith.index_cast %arg2 : i32 to index
    %c0 = arith.constant 0 : index
    %c0_0 = arith.constant 0 : index
    %1 = vector.load %arg4[%0, %c0, %c0_0] : memref<4x1x128xf32, #tpu.memory_space<vmem>>, vector<1x1x128xf32>
    %2 = vector.shape_cast %1 : vector<1x1x128xf32> to vector<1x128xf32>
    %c0_1 = arith.constant 0 : index
    %c0_2 = arith.constant 0 : index
    %c0_3 = arith.constant 0 : index
    %c0_4 = arith.constant 0 : index
    %3 = vector.load %arg3[%c0_1, %c0_2, %c0_3, %c0_4] : memref<2x1x8x128xf32, #tpu.memory_space<vmem>>, vector<2x1x8x128xf32>
    %4 = vector.shape_cast %3 : vector<2x1x8x128xf32> to vector<2x8x128xf32>
    %5 = vector.shape_cast %2 : vector<1x128xf32> to vector<1x1x128xf32>
    %6 = vector.broadcast %5 : vector<1x1x128xf32> to vector<2x8x128xf32>
    %7 = arith.addf %4, %6 : vector<2x8x128xf32>
    %c0_5 = arith.constant 0 : index
    %c0_6 = arith.constant 0 : index
    %c0_7 = arith.constant 0 : index
    %c0_8 = arith.constant 0 : index
    %8 = vector.load %arg5[%c0_5, %c0_6, %c0_7, %c0_8] : memref<2x1x8x128xf32, #tpu.memory_space<vmem>>, vector<2x1x8x128xf32>
    %9 = vector.shape_cast %8 : vector<2x1x8x128xf32> to vector<2x8x128xf32>
    %10 = vector.shape_cast %7 : vector<2x8x128xf32> to vector<2x1x8x128xf32>
    tpu.vector_store %arg5[%c0_5, %c0_6, %c0_7, %c0_8], %10 {strides = array<i32>} : memref<2x1x8x128xf32, #tpu.memory_space<vmem>>, vector<2x1x8x128xf32>,
    return
  }
  func.func @transform_0(%arg0: i32, %arg1: i32, %arg2: i32) -> (i32, i32, i32, i32) {
    %c0_i32 = arith.constant 0 : i32
    %c0_i32_0 = arith.constant 0 : i32
    return %arg0, %arg2, %arg1, %c0_i32 : i32, i32, i32, i32
  }
  func.func @transform_1(%arg0: i32, %arg1: i32, %arg2: i32) -> (i32, i32, i32) {
    %c0_i32 = arith.constant 0 : i32
    %c0_i32_0 = arith.constant 0 : i32
    %c0_i32_1 = arith.constant 0 : i32
    %c0_i32_2 = arith.constant 0 : i32
    return %c0_i32, %c0_i32_0, %c0_i32_1 : i32, i32, i32
  }
  func.func @transform_2(%arg0: i32, %arg1: i32, %arg2: i32) -> (i32, i32, i32, i32) {
    %c0_i32 = arith.constant 0 : i32
    %c0_i32_0 = arith.constant 0 : i32
    return %arg0, %arg2, %arg1, %c0_i32 : i32, i32, i32, i32
  }
}

</mosaic_0001>

<bundles_post_ra>
// kernel: tpu_custom_call.1
= control target key start
LH: loop header
LB: loop body
LE: loop exit
PB: predicated region body
PF: predicated region fallthrough
CT: control target
= control target key end

     0   :  { %7 = vsyncpa [#allocation3], 0  ;;  %s822_s0 = inlined_call_operand.hbm [shape: f32[2,4,8,128], index: 0, kind: input, shape index: {}]   ;;  %s823_s1 = inlined_call_operand.hbm [shape: f32[4,1,128], index: 1, kind: input, shape index: {}]   ;;  %s824_s2 = inlined_call_operand.hbm [shape: f32[2,4,8,128], index: 2, kind: output, shape index: {}]  }
   0x1   :  { %9 = vsyncpa [#allocation3 + $0x1], 0 }
   0x2   :  { %10 = vsyncpa [#allocation6], 0 }
   0x3   :  { %11 = vsyncpa [#allocation4], 0 }
   0x4   :  { %13 = vsyncpa [#allocation4 + $0x1], 0  ;;  %s610_s9 = smov 0   ;;  %s612_s10 = smov 0  }
   0x5   :  { %s614_s11 = smov 0   ;;  %s616_s12 = smov 0  }
   0x6   :  { %s618_s13 = smov 0   ;;  %s620_s14 = smov 0  }
   0x7 LB: > { %s341_s15 = sadd.s32 4294967295, %s582_s14   ;;  %s342_s16 = sadd.s32 4294967294, %s582_s14   ;;  %s582_s14 = sphi %s620_s14, %s19_s14   ;;  %s578_s13 = sphi %s618_s13, %s849_s13   ;;  %s574_s12 = sphi %s616_s12, %s848_s12   ;;  %s570_s11 = sphi %s614_s11, %s847_s11   ;;  %s566_s10 = sphi %s612_s10, %s846_s10   ;;  %s562_s9 = sphi %s610_s9, %s845_s9  }
   0x8   : > { %p56_p0 = scmp.ne.s32.totalorder %s570_s11, %s566_s10  ;;  %p57_p1 = scmp.eq.s32.totalorder %s582_s14, 0 }
   0x9   : > { %p62_p2 = scmp.ne.s32.totalorder %s566_s10, %s562_s9  ;;  %p647_p3 = scmp.eq.s32.totalorder %s341_s15, 0 }
   0xa   : > { %p651_p4 = por %p57_p1, %p56_p0  ;;  %p111_p5 = scmp.eq.s32.totalorder %s341_s15, 3 }
   0xb   : > { %s831_s17 = scalar_select %p647_p3, 1, 0 }
   0xc   : > { %p657_p6 = por %p647_p3, %p62_p2  ;;  %p117_p7 = scmp.eq.s32.totalorder %s342_s16, 3 }
   0xd   : > { %p661_p8 = por %p111_p5, %p56_p0  ;;  %p343_p9 = scmp.ge.s32.totalorder %s582_s14, 1 }
   0xe   : > { %s833_s19 = scalar_select %p657_p6, 1, 0 }
   0xf   : > { %s834_s20 = scalar_select %p661_p8, 1, 0 }
  0x10   : > { %p666_p10 = por %p117_p7, %p62_p2  ;;  %p124_p11 = scmp.lt.s32.totalorder %s582_s14, 5 }
  0x11   : > { %s584_s23 = smov [#allocation5]   ;;  %p378_p0 = scmp.lt.s32.totalorder %s582_s14, 4 }
  0x12   : > { %s835_s21 = scalar_select %p666_p10, 1, 0 }
  0x13   : > { %p671_p12 = pnand %p343_p9, %p124_p11  ;;  %s136_s24 = sshll.u32 %s584_s23, 4  ;;  %s137_s24 = int_to_ptr.vmem [resolvable:$true] %s136_s24 }
  0x14   : > { %p686_p2 = pnand %p378_p0, %p651_p4  ;;  %s31_s27 = sadd.s32 1, %s578_s13 }
  0x15   : > { %s836_s22 = scalar_select %p671_p12, 1, 0 }
  0x16   : > { %p365_p13 = pneg %p671_p12  ;;  %s438_s30 = scalar_lea.hbm %s823_s1, 64 }
  0x17   : > { %s838_s26 = scalar_select %p686_p2, 1, 0 }
  0x18   : > { %p680_p1 = pnand %p365_p13, %p647_p3  ;;  %p439_p5 = scmp.ne.s32.totalorder %s823_s1, %s438_s30 }
  0x19   : > { %p445_p4 = scmp.lt.u32.totalorder %s438_s30, %s823_s1 }
  0x1a   : > { %p440_p7 = pneg %p680_p1 }
  0x1c   : > { %p441_p9 = pnand %p440_p7, %p439_p5 }
  0x1e   : > { %p442_p11 = pneg %p441_p9 }
  0x20   : > { %p447_p13 = pnand %p445_p4, %p442_p11 }
  0x22   : > { %450 = shalt.err (!%p447_p13)
}
  0x23   : > { %s451_s7 = scalar_lea.vmem %s137_s24, 64  ;;  %p459_p3 = scmp.lt.s32.totalorder %s137_s24, %s137_s24 }
  0x24   : > { %p452_p0 = scmp.ne.s32.totalorder %s137_s24, %s451_s7  ;;  %p460_p6 = scmp.lt.s32.totalorder %s451_s7, %s451_s7 }
  0x26   : > { %p454_p10 = pnand %p452_p0, %p440_p7  ;;  %p461_p12 = por %p460_p6, %p459_p3 }
  0x28   : > { %p455_p8 = pneg %p454_p10 }
  0x2a   : > { %p462_p2 = pnand %p461_p12, %p455_p8 }
  0x2c   : > { %465 = shalt.err (!%p462_p2)
}
  0x2d   : > { %s585_s8 = smov 16   ;;  %s586_s15 = smov 1  }
  0x2e   : > { %368 = dma.hbm_to_vmem [thread:$0]  (!%p680_p1), %s823_s1, 64, %s137_s24, [#allocation6], %s585_s8, %s585_s8, %s586_s15  }
  0x2f   : > { %p32_p5 = scmp.ge.s32.totalorder %s31_s27, 4  ;;  %s49_s23 = sadd.s32 1, %s570_s11 }
  0x30   : > { %s150_s28 = sand.u32 1, %s570_s11   ;;  %s347_s3 = sshll.u32 %s578_s13, 7 }
  0x31   : > { %s851_s27 = smov (%p32_p5, %s31_s27), 0  ;;  %s346_s29 = sshll.u32 %s150_s28, 4 }
  0x32   : > { %s43_s30 = ssub.s32 %s578_s13, %s851_s27  ;;  %s717_s25 = scalar_lea.hbm %s822_s0, %s347_s3 }
  0x33   : > { %p47_p3 = scmp.eq.s32.totalorder %s43_s30, 0  ;;  %s154_s24 = scalar_lea.vmem [#allocation2], %s346_s29 }
  0x34   : > { %s164_s6 = sshll.u32 %s154_s24, 4  ;;  %s724_s8 = scalar_lea.sflag [#allocation3], %s150_s28  ;;  %s722_s6 = int_to_ptr.vmem [resolvable:$true] %s164_s6 }
  0x35   : > { %s720_s7 = scalar_select %p47_p3, %s570_s11, %s49_s23  }
  0x36   : > { %s466_s15 = scalar_lea.hbm %s717_s25, 256  ;;  %p839_p8 = scmp.ne.s32.totalorder %s838_s26, 0 }
  0x37   : > { %p467_p6 = scmp.ne.s32.totalorder %s717_s25, %s466_s15  ;;  %s471_s30 = scalar_lea.hbm %s822_s0, 1024 }
  0x38   : > { %p468_p10 = pneg %p839_p8  ;;  %p472_p2 = scmp.lt.u32.totalorder %s717_s25, %s822_s0 }
  0x39   : > { %p473_p7 = scmp.lt.u32.totalorder %s471_s30, %s466_s15  ;;  %p475_p11 = scmp.lt.u32.totalorder %s466_s15, %s717_s25 }
  0x3a   : > { %p469_p12 = pnand %p468_p10, %p467_p6 }
  0x3b   : > { %p474_p9 = por %p473_p7, %p472_p2 }
  0x3c   : > { %p470_p1 = pneg %p469_p12 }
  0x3d   : > { %p476_p4 = por %p475_p11, %p474_p9 }
  0x3f   : > { %p477_p13 = pnand %p476_p4, %p470_p1 }
  0x41   : > { %480 = shalt.err (!%p477_p13)
}
  0x42   : > { %s481_s23 = scalar_lea.vmem %s722_s6, 256  ;;  %s587_s28 = smov [#allocation2]  }
  0x43   : > { %p482_p0 = scmp.ne.s32.totalorder %s722_s6, %s481_s23  ;;  %s486_s4 = sshll.u32 %s587_s28, 4  ;;  %s487_s4 = int_to_ptr.vmem [resolvable:$false] %s486_s4 }
  0x44   : > { %s488_s5 = scalar_lea.vmem %s487_s4, 512  ;;  %p489_p6 = scmp.lt.s32.totalorder %s722_s6, %s487_s4 }
  0x45   : > { %p484_p5 = pnand %p482_p0, %p468_p10  ;;  %p490_p12 = scmp.lt.s32.totalorder %s488_s5, %s481_s23 }
  0x47   : > { %p485_p3 = pneg %p484_p5  ;;  %p491_p2 = por %p490_p12, %p489_p6 }
  0x49   : > { %p492_p7 = pnand %p491_p2, %p485_p3 }
  0x4b   : > { %495 = shalt.err (!%p492_p7)
}
  0x4c   : > { %s588_s24 = smov 512   ;;  %s589_s15 = smov 128  }
  0x4d   : > { %s590_s16 = smov 8   ;;  %p840_p10 = scmp.ne.s32.totalorder %s836_s22, 0 }
  0x4e   : > { %372 = dma.hbm_to_vmem [thread:$0]  (!%p839_p8), %s717_s25, 256, %s722_s6, %s724_s8, %s588_s24, %s589_s15, %s590_s16  }
  0x4f   : > { %176 = sbr.rel (%p840_p10) target bundleno = 118 (0x76), region = 28  ;;  %s755_s18 = sand.u32 (!%p840_p10), 1, %s566_s10  }
  0x50   : > { %s349_s30 = sshll.u32 (!%p840_p10), %s755_s18, 4  ;;  %s179_s29 = scalar_lea.sflag (!%p840_p10), [#allocation3], %s755_s18 }
  0x51   : > { %s182_s3 = scalar_lea.vmem (!%p840_p10), [#allocation2], %s349_s30  ;;  %p841_p1 = scmp.ne.s32.totalorder (!%p840_p10), %s833_s19, 0 }
  0x56   : > { %549 = dma.done.wait (%p841_p1), %s179_s29, 256  }
  0x57   : > { %551 = vsyncadd (%p841_p1), %s179_s29, 4294967040  ;;  %p842_p9 = scmp.ne.s32.totalorder %s831_s17, 0 }
  0x59   : > { %553 = dma.done.wait (%p842_p9), [#allocation6], 64  }
  0x5a   : > { %555 = vsyncadd (%p842_p9), [#allocation6], 4294967232  ;;  %s206_s22 = scalar_lea.vmem [#allocation7], %s349_s30  ;;  %s354_s25 = sshll.u32 %s574_s12, 7  ;;  %v211_v1 = vld [vmem:[%s182_s3] sm:$0xff]  ;;  %v212_v2 = vld [vmem:[%s182_s3 + $0x8] sm:$0xff] }
  0x5b   : > { %s240_s26 = sshll.u32 %s206_s22, 4  ;;  %s209_s6 = scalar_lea.vmem [#allocation5], %s574_s12  ;;  %s768_s26 = int_to_ptr.vmem [resolvable:$true] %s240_s26 }
  0x5c   : > { %v352_v0 = vld [vmem:[%s209_s6] ss:$0 sm:$0xff]  ;;  %s774_s17 = scalar_lea.hbm %s824_s2, %s354_s25  ;;  %s224_s23 = scalar_lea.sflag [#allocation4], %s755_s18 }
  0x5d   : > { %v219_v3 = vadd.f32 %v352_v0, %v211_v1  ;;  %v220_v4 = vadd.f32 %v352_v0, %v212_v2  ;;  %s496_s28 = scalar_lea.vmem %s768_s26, 256  ;;  %p843_p11 = scmp.ne.s32.totalorder %s834_s20, 0 }
  0x5e   : > { %p497_p8 = scmp.ne.s32.totalorder %s768_s26, %s496_s28  ;;  %s591_s12 = smov [#allocation7]  }
  0x5f   : > { %221 = vst [vmem:[%s206_s22] sm:$0xff] %v219_v3  ;;  %222 = vst [vmem:[%s206_s22 + $0x8] sm:$0xff] %v220_v4  ;;  %s500_s4 = sshll.u32 %s591_s12, 4  ;;  %s501_s4 = int_to_ptr.vmem [resolvable:$false] %s500_s4 }
  0x60   : > { %p498_p4 = pnand %p497_p8, %p843_p11  ;;  %s502_s5 = scalar_lea.vmem %s501_s4, 512 }
  0x61   : > { %p503_p0 = scmp.lt.s32.totalorder %s768_s26, %s501_s4  ;;  %p504_p5 = scmp.lt.s32.totalorder %s502_s5, %s496_s28 }
  0x62   : > { %p499_p13 = pneg %p498_p4 }
  0x63   : > { %p505_p3 = por %p504_p5, %p503_p0 }
  0x65   : > { %p506_p6 = pnand %p505_p3, %p499_p13 }
  0x67   : > { %509 = shalt.err (!%p506_p6)
}
  0x68   : > { %s510_s24 = scalar_lea.hbm %s774_s17, 256  ;;  %s514_s30 = scalar_lea.hbm %s824_s2, 1024 }
  0x69   : > { %p511_p12 = scmp.ne.s32.totalorder %s774_s17, %s510_s24  ;;  %p515_p10 = scmp.lt.u32.totalorder %s774_s17, %s824_s2 }
  0x6a   : > { %p516_p1 = scmp.lt.u32.totalorder %s514_s30, %s510_s24  ;;  %p518_p8 = scmp.lt.u32.totalorder %s510_s24, %s774_s17 }
  0x6b   : > { %p512_p2 = pnand %p511_p12, %p843_p11 }
  0x6c   : > { %p517_p9 = por %p516_p1, %p515_p10 }
  0x6d   : > { %p513_p7 = pneg %p512_p2 }
  0x6e   : > { %p519_p4 = por %p518_p8, %p517_p9 }
  0x70   : > { %p520_p13 = pnand %p519_p4, %p513_p7 }
  0x72   : > { %523 = shalt.err (!%p520_p13)
}
  0x73   : > { %s592_s22 = smov 128   ;;  %s593_s25 = smov 512  }
  0x74   : > { %s594_s6 = smov 8  }
  0x75   : > { %363 = dma.vmem_to_hbm [thread:$0]  (%p843_p11), %s768_s26, 256, %s774_s17, %s224_s23, %s592_s22, %s593_s25, %s594_s6  }
  0x76 PF: > { %p380_p0 = scmp.ge.s32.totalorder %s582_s14, 2  ;;  %s255_s19 = sand.u32 1, %s562_s9  }
  0x77   : > { %p844_p5 = scmp.ne.s32.totalorder %s835_s21, 0  ;;  %s256_s8 = scalar_lea.sflag [#allocation4], %s255_s19 }
  0x79   : > { %p374_p3 = pnand %p380_p0, %p844_p5 }
  0x7b   : > { %557 = dma.done.wait (!%p374_p3), %s256_s8, 256  }
  0x7c   : > { %559 = vsyncadd (!%p374_p3), %s256_s8, 4294967040  ;;  %s19_s14 = sadd.s32 1, %s582_s14   ;;  %s845_s9 = smov %s566_s10 }
  0x7d   : > { %p16_p6 = scmp.ge.s32.totalorder %s19_s14, 6   ;;  %s846_s10 = smov %s570_s11 }
  0x7e   : > { %s847_s11 = smov %s720_s7  ;;  %s848_s12 = smov %s578_s13 }
  0x7f   : > { %s849_s13 = smov %s851_s27  ;;  %18 = sbr.rel (!%p16_p6) target bundleno = 7 (0x7), region = 78 }
  0x86   :  { %261 = vsyncpa [#allocation3], 1 }
  0x87   :  { %263 = vsyncpa [#allocation3 + $0x1], 1 }
  0x88   :  { %264 = vsyncpa [#allocation6], 1 }
  0x89   :  { %265 = vsyncpa [#allocation4], 1 }
  0x8a   :  { %267 = vsyncpa [#allocation4 + $0x1], 1 }

</bundles_post_ra>
